<compile_context>
chip_gen: v7x
topology: tpu7x:2x2x1
jax: 0.10.0
libtpu: 0.0.40
codegen_flags: <defaults>
</compile_context>

<pallas_src>
import functools
import math

import jax
import jax.numpy as jnp
from jax import lax
from jax.experimental import pallas as pl
from jax.experimental.pallas import tpu as pltpu


_D_TILE_MAX = 8192                          # max lanes per streamed block (multiple of 128)
_MIN_STREAM_STEPS = 8                       # keep >= this many grid steps for a pipeline steady state
_SINGLE_PASS_MAX_BYTES = 8 * 1024 * 1024    # below this, stream everything in one block


def _round_up(x, m):
    return ((x + m - 1) // m) * m


def _stream_spec(shape, index_map):
    """BlockSpec for a streamed operand; asks for 3-deep buffering when available."""
    buffered = getattr(pl, "Buffered", None)
    if buffered is not None:
        try:
            return pl.BlockSpec(shape, index_map, pipeline_mode=buffered(3))
        except TypeError:
            pass
    return pl.BlockSpec(shape, index_map)


def _gp_single_kernel(real_ref, fake_ref, w1_ref, alpha_ref, b1_ref, w2_ref,
                      out_ref, *, inv_batch):
    """Single-pass path: whole (B, D)/(H, D) operands live in VMEM; no accumulators."""
    alpha = alpha_ref[...]                                            # (B, 1) f32
    x = (alpha * real_ref[...].astype(jnp.float32)
         + (1.0 - alpha) * fake_ref[...].astype(jnp.float32))         # (B, D) f32
    w1 = w1_ref[...].astype(jnp.float32)                              # (H, D) f32

    h = lax.dot_general(x, w1, (((1,), (1,)), ((), ())),
                        preferred_element_type=jnp.float32)           # (B, H)
    a = jnp.tanh(h + b1_ref[...])
    # grads = (fake_label * (1 - a^2) * W2) @ W1; fake_label already folded into w2_ref.
    da = (1.0 - a * a) * w2_ref[...]                                  # (B, H)
    grads = jnp.dot(da, w1, preferred_element_type=jnp.float32)       # (B, D)
    norm2 = jnp.sum(grads * grads, axis=1, keepdims=True)             # (B, 1)
    sq = (jnp.sqrt(norm2) - 1.0) ** 2
    out_ref[...] = jnp.sum(sq, axis=0, keepdims=True) * inv_batch


def _gp_stream_kernel(real_ref, fake_ref, w1_ref, alpha_ref, b1_ref, w2_ref,
                      out_ref, h_acc, g_acc, *, inv_batch, d_total, d_tile):
    """Streaming path: D is a grid reduction axis; h and Gram(W1) accumulate in VMEM."""
    k = pl.program_id(0)

    @pl.when(k == 0)
    def _init():
        h_acc[...] = jnp.zeros_like(h_acc)
        g_acc[...] = jnp.zeros_like(g_acc)

    alpha = alpha_ref[...]                                            # (B, 1)
    x = (alpha * real_ref[...].astype(jnp.float32)
         + (1.0 - alpha) * fake_ref[...].astype(jnp.float32))         # (B, Dt)
    w1 = w1_ref[...].astype(jnp.float32)                              # (H, Dt)

    if d_total % d_tile != 0:
        # Ragged last tile: out-of-range lanes are NOT zero-filled by Pallas, so
        # mask both operands (protects even against NaN garbage in stale VMEM).
        lane = lax.broadcasted_iota(jnp.int32, (1, d_tile), 1) + k * d_tile
        valid = lane < d_total
        x = jnp.where(valid, x, 0.0)
        w1 = jnp.where(valid, w1, 0.0)

    # Streaming accumulation over D (MXU, f32 accumulators).
    h_acc[...] += lax.dot_general(x, w1, (((1,), (1,)), ((), ())),
                                  preferred_element_type=jnp.float32)  # (B, H)
    g_acc[...] += lax.dot_general(w1, w1, (((1,), (1,)), ((), ())),
                                  preferred_element_type=jnp.float32)  # (H, H)

    @pl.when(k == pl.num_programs(0) - 1)
    def _finalize():
        a = jnp.tanh(h_acc[...] + b1_ref[...])                        # (B, H)
        da = (1.0 - a * a) * w2_ref[...]                              # (B, H)
        # ||grads_i||^2 = da_i @ (W1 W1^T) @ da_i^T = rowsum((da @ G) * da)
        dg = jnp.dot(da, g_acc[...], preferred_element_type=jnp.float32)
        norm2 = jnp.sum(dg * da, axis=1, keepdims=True)               # (B, 1)
        sq = (jnp.sqrt(norm2) - 1.0) ** 2
        out_ref[...] = jnp.sum(sq, axis=0, keepdims=True) * inv_batch


@jax.jit
def gradient_penalty(samples_real, samples_fake, alpha, w1, b1, w2, fake_label):
    """samples_real/fake: (B, C, H, W). alpha: (B, 1) mixing coeffs. Returns scalar penalty."""
    bsz = samples_real.shape[0]
    d = math.prod(samples_real.shape[1:])
    hid = w1.shape[0]

    # No host-side padding / copies: flatten is a free reshape; everything else
    # streams at its natural size in its native dtype.
    real2d = samples_real.reshape(bsz, d)
    fake2d = samples_fake.reshape(bsz, d)
    alphap = alpha.reshape(bsz, 1).astype(jnp.float32)
    b1r = b1.reshape(1, hid).astype(jnp.float32)
    # Fold the autograd cotangent (fake_label) into W2: a 32-element multiply.
    w2r = jnp.asarray(fake_label, jnp.float32) * w2.reshape(1, hid).astype(jnp.float32)

    in_itemsize = jnp.dtype(samples_real.dtype).itemsize
    w1_itemsize = jnp.dtype(w1.dtype).itemsize
    bytes_per_col = 2 * bsz * in_itemsize + hid * w1_itemsize
    total_stream_bytes = d * bytes_per_col

    resident_specs = [
        pl.BlockSpec((bsz, 1), lambda k: (0, 0)),    # alpha  (resident)
        pl.BlockSpec((1, hid), lambda k: (0, 0)),    # b1     (resident)
        pl.BlockSpec((1, hid), lambda k: (0, 0)),    # fake_label * W2 (resident)
    ]

    if total_stream_bytes <= _SINGLE_PASS_MAX_BYTES:
        # Small/medium D: one grid step, no scratch, no pl.when branches.
        kernel = functools.partial(_gp_single_kernel, inv_batch=1.0 / bsz)
        grid = (1,)
        in_specs = [
            pl.BlockSpec((bsz, d), lambda k: (0, 0)),   # real
            pl.BlockSpec((bsz, d), lambda k: (0, 0)),   # fake
            pl.BlockSpec((hid, d), lambda k: (0, 0)),   # W1
        ] + resident_specs
        scratch_shapes = []
        tile_bytes = total_stream_bytes
        flops = 4 * bsz * hid * d + 4 * bsz * d
        vmem_limit = min(48 << 20, max(8 << 20, 2 * tile_bytes + (4 << 20)))
    else:
        # Large D: stream over a reduction grid; tile sized from VMEM headroom.
        d_tile = min(_D_TILE_MAX,
                     max(512, _round_up(pl.cdiv(d, _MIN_STREAM_STEPS), 128)))
        num_k = pl.cdiv(d, d_tile)
        kernel = functools.partial(_gp_stream_kernel, inv_batch=1.0 / bsz,
                                   d_total=d, d_tile=d_tile)
        grid = (num_k,)
        in_specs = [
            _stream_spec((bsz, d_tile), lambda k: (0, k)),   # real (streamed)
            _stream_spec((bsz, d_tile), lambda k: (0, k)),   # fake (streamed)
            _stream_spec((hid, d_tile), lambda k: (0, k)),   # W1   (streamed)
        ] + resident_specs
        scratch_shapes = [pltpu.VMEM((bsz, hid), jnp.float32),   # h accumulator
                          pltpu.VMEM((hid, hid), jnp.float32)]  # Gram accumulator
        tile_bytes = d_tile * bytes_per_col
        flops = (2 * bsz * hid * d + 2 * hid * hid * d
                 + 2 * bsz * hid * hid + 4 * bsz * d)
        vmem_limit = min(48 << 20, max(8 << 20, 5 * tile_bytes + (2 << 20)))

    cost = pl.CostEstimate(
        flops=int(flops),
        transcendentals=int(bsz * hid),
        bytes_accessed=int(2 * bsz * d * in_itemsize + hid * d * w1_itemsize
                           + (bsz + 2 * hid + 1) * 4),
    )

    grid_spec = pltpu.PrefetchScalarGridSpec(
        num_scalar_prefetch=0,
        grid=grid,
        in_specs=in_specs,
        out_specs=pl.BlockSpec((1, 1), lambda k: (0, 0)),
        scratch_shapes=scratch_shapes,
    )

    out = pl.pallas_call(
        kernel,
        out_shape=jax.ShapeDtypeStruct((1, 1), jnp.float32),
        grid_spec=grid_spec,
        compiler_params=pltpu.CompilerParams(
            dimension_semantics=("arbitrary",),          # D is a reduction axis
            vmem_limit_bytes=int(vmem_limit),
        ),
        cost_estimate=cost,
    )(real2d, fake2d, w1, alphap, b1r, w2r)
    return out[0, 0]


def _reference(samples_real, samples_fake, alpha, w1, b1, w2, b2, fake_label):
    """Pure-JAX reference that mirrors the PyTorch module via autodiff (vjp)."""
    bsz = samples_real.shape[0]
    a4 = alpha.reshape(bsz, 1, 1, 1)
    interp = a4 * samples_real + (1.0 - a4) * samples_fake

    def critic(x):
        xf = x.reshape(bsz, -1)
        h = jnp.tanh(xf @ w1.T + b1)
        return h @ w2.T + b2                                   # (B, 1) scores

    scores, vjp_fn = jax.vjp(critic, interp)
    cotangent = jnp.full_like(scores, fake_label)              # fake_label.expand_as(scores)
    (grads,) = vjp_fn(cotangent)
    grads = grads.reshape(bsz, -1)
    norms = jnp.sqrt(jnp.sum(grads * grads, axis=1))
    return jnp.mean((norms - 1.0) ** 2)


if __name__ == "__main__":
    key = jax.random.PRNGKey(0)

    def make_case(case_key, B, C, H, W, HID):
        k_real, k_fake, k_alpha, k_w1, k_b1, k_w2 = jax.random.split(case_key, 6)
        D = C * H * W
        samples_real = jax.random.normal(k_real, (B, C, H, W), jnp.float32)
        samples_fake = jax.random.normal(k_fake, (B, C, H, W), jnp.float32)
        # torch.rand((B, 1, 1, 1)) -> per-sample mixing coefficient (explicit input here)
        alpha = jax.random.uniform(k_alpha, (B, 1), jnp.float32)
        # deterministic critic parameters (2-layer tanh MLP on the flattened input)
        w1 = jax.random.normal(k_w1, (HID, D), jnp.float32) / jnp.sqrt(jnp.float32(D))
        b1 = 0.01 * jax.random.normal(k_b1, (HID,), jnp.float32)
        w2 = jax.random.normal(k_w2, (1, HID), jnp.float32) / jnp.sqrt(jnp.float32(HID))
        b2 = jnp.zeros((1,), jnp.float32)   # score bias; does not affect the gradient/penalty
        return samples_real, samples_fake, alpha, w1, b1, w2, b2

    # Module default is fake_label=0.0 (trivially yields penalty == 1.0);
    # use 1.0 to exercise the full path.
    fake_label = jnp.float32(1.0)
    k1, k2 = jax.random.split(key)

    # Case 1 (module-sized): B=2, C=4, 16x16 -> D=1024; exercises the single-pass path.
    real, fake, alpha, w1, b1, w2, b2 = make_case(k1, 2, 4, 16, 16, 32)
    pen = jax.block_until_ready(
        gradient_penalty(real, fake, alpha, w1, b1, w2, fake_label))
    ref = _reference(real, fake, alpha, w1, b1, w2, b2, fake_label)
    assert jnp.allclose(pen, ref, rtol=1e-4, atol=1e-5), (pen, ref)

    # Case 2: large flattened dim (D=76800, not a multiple of the tile) ->
    # exercises the streaming path with in-kernel masking of the ragged last tile.
    real, fake, alpha, w1, b1, w2, b2 = make_case(k2, 2, 3, 160, 160, 32)
    pen = jax.block_until_ready(
        gradient_penalty(real, fake, alpha, w1, b1, w2, fake_label))
    ref = _reference(real, fake, alpha, w1, b1, w2, b2, fake_label)
    assert jnp.allclose(pen, ref, rtol=5e-4, atol=1e-5), (pen, ref)

    print("KERNEL_OK")
</pallas_src>

<mosaic_0001>
module attributes {stable_mosaic.version = 11 : i64} {
  func.func @_gp_single_kernel(%arg0: i32, %arg1: memref<2x1024xf32, #tpu.memory_space<vmem>>, %arg2: memref<2x1024xf32, #tpu.memory_space<vmem>>, %arg3: memref<32x1024xf32, #tpu.memory_space<vmem>>, %arg4: memref<2x1xf32, #tpu.memory_space<vmem>>, %arg5: memref<1x32xf32, #tpu.memory_space<vmem>>, %arg6: memref<1x32xf32, #tpu.memory_space<vmem>>, %arg7: memref<1x1xf32, #tpu.memory_space<vmem>>) attributes {dimension_semantics = [#tpu.dimension_semantics<arbitrary>], iteration_bounds = array<i64: 1>, scalar_prefetch = 0 : i64, scratch_operands = 0 : i64, tpu.core_type = #tpu.core_type<tc>, window_params = [{pipeline_mode = #tpu.pipeline_mode<synchronous>, transform_indices = @transform_0, window_bounds = array<i64: 2, 1024>}, {pipeline_mode = #tpu.pipeline_mode<synchronous>, transform_indices = @transform_1, window_bounds = array<i64: 2, 1024>}, {pipeline_mode = #tpu.pipeline_mode<synchronous>, transform_indices = @transform_2, window_bounds = array<i64: 32, 1024>}, {pipeline_mode = #tpu.pipeline_mode<synchronous>, transform_indices = @transform_3, window_bounds = array<i64: 2, 1>}, {pipeline_mode = #tpu.pipeline_mode<synchronous>, transform_indices = @transform_4, window_bounds = array<i64: 1, 32>}, {pipeline_mode = #tpu.pipeline_mode<synchronous>, transform_indices = @transform_5, window_bounds = array<i64: 1, 32>}, {pipeline_mode = #tpu.pipeline_mode<synchronous>, transform_indices = @transform_6, window_bounds = array<i64: 1, 1>}]} {
    %c0 = arith.constant 0 : index
    %c0_0 = arith.constant 0 : index
    %0 = vector.load %arg4[%c0, %c0_0] : memref<2x1xf32, #tpu.memory_space<vmem>>, vector<2x1xf32>
    %c0_1 = arith.constant 0 : index
    %c0_2 = arith.constant 0 : index
    %1 = vector.load %arg1[%c0_1, %c0_2] : memref<2x1024xf32, #tpu.memory_space<vmem>>, vector<2x1024xf32>
    %2 = vector.broadcast %0 : vector<2x1xf32> to vector<2x1024xf32>
    %3 = arith.mulf %2, %1 : vector<2x1024xf32>
    %cst = arith.constant 1.000000e+00 : f32
    %4 = vector.broadcast %cst : f32 to vector<2x1xf32>
    %5 = arith.subf %4, %0 : vector<2x1xf32>
    %c0_3 = arith.constant 0 : index
    %c0_4 = arith.constant 0 : index
    %6 = vector.load %arg2[%c0_3, %c0_4] : memref<2x1024xf32, #tpu.memory_space<vmem>>, vector<2x1024xf32>
    %7 = vector.broadcast %5 : vector<2x1xf32> to vector<2x1024xf32>
    %8 = arith.mulf %7, %6 : vector<2x1024xf32>
    %9 = arith.addf %3, %8 : vector<2x1024xf32>
    %c0_5 = arith.constant 0 : index
    %c0_6 = arith.constant 0 : index
    %10 = vector.load %arg3[%c0_5, %c0_6] : memref<32x1024xf32, #tpu.memory_space<vmem>>, vector<32x1024xf32>
    %cst_7 = arith.constant dense<0.000000e+00> : vector<2x32xf32>
    %11 = tpu.matmul %9, %10, %cst_7 {dimension_numbers = #tpu.dot_dimension_numbers<[1], [1], [0], [0], [0, 0, 1, 0], [], []>} : vector<2x1024xf32>, vector<32x1024xf32>, vector<2x32xf32> -> vector<2x32xf32>
    %c0_8 = arith.constant 0 : index
    %c0_9 = arith.constant 0 : index
    %12 = vector.load %arg5[%c0_8, %c0_9] : memref<1x32xf32, #tpu.memory_space<vmem>>, vector<1x32xf32>
    %13 = vector.broadcast %12 : vector<1x32xf32> to vector<2x32xf32>
    %14 = arith.addf %11, %13 : vector<2x32xf32>
    %15 = math.tanh %14 : vector<2x32xf32>
    %16 = arith.mulf %15, %15 : vector<2x32xf32>
    %cst_10 = arith.constant 1.000000e+00 : f32
    %17 = vector.broadcast %cst_10 : f32 to vector<2x32xf32>
    %18 = arith.subf %17, %16 : vector<2x32xf32>
    %c0_11 = arith.constant 0 : index
    %c0_12 = arith.constant 0 : index
    %19 = vector.load %arg6[%c0_11, %c0_12] : memref<1x32xf32, #tpu.memory_space<vmem>>, vector<1x32xf32>
    %20 = vector.broadcast %19 : vector<1x32xf32> to vector<2x32xf32>
    %21 = arith.mulf %18, %20 : vector<2x32xf32>
    %cst_13 = arith.constant dense<0.000000e+00> : vector<2x1024xf32>
    %22 = tpu.matmul %21, %10, %cst_13 {dimension_numbers = #tpu.dot_dimension_numbers<[1], [0], [0], [1], [0, 0, 1, 1], [], []>} : vector<2x32xf32>, vector<32x1024xf32>, vector<2x1024xf32> -> vector<2x1024xf32>
    %23 = arith.mulf %22, %22 : vector<2x1024xf32>
    %cst_14 = arith.constant dense<0.000000e+00> : vector<2xf32>
    %24 = vector.multi_reduction <add>, %23, %cst_14 [1] : vector<2x1024xf32> to vector<2xf32>
    %25 = vector.shape_cast %24 : vector<2xf32> to vector<2x1xf32>
    %26 = math.sqrt %25 : vector<2x1xf32>
    %cst_15 = arith.constant 1.000000e+00 : f32
    %27 = vector.broadcast %cst_15 : f32 to vector<2x1xf32>
    %28 = arith.subf %26, %27 : vector<2x1xf32>
    %29 = arith.mulf %28, %28 : vector<2x1xf32>
    %cst_16 = arith.constant dense<0.000000e+00> : vector<1xf32>
    %30 = vector.multi_reduction <add>, %29, %cst_16 [0] : vector<2x1xf32> to vector<1xf32>
    %31 = vector.shape_cast %30 : vector<1xf32> to vector<1x1xf32>
    %cst_17 = arith.constant 5.000000e-01 : f32
    %32 = vector.broadcast %cst_17 : f32 to vector<1x1xf32>
    %33 = arith.mulf %31, %32 : vector<1x1xf32>
    %c0_18 = arith.constant 0 : index
    %c0_19 = arith.constant 0 : index
    %34 = vector.load %arg7[%c0_18, %c0_19] : memref<1x1xf32, #tpu.memory_space<vmem>>, vector<1x1xf32>
    tpu.vector_store %arg7[%c0_18, %c0_19], %33 {strides = array<i32>} : memref<1x1xf32, #tpu.memory_space<vmem>>, vector<1x1xf32>,
    return
  }
  func.func @transform_0(%arg0: i32) -> (i32, i32) {
    %c0_i32 = arith.constant 0 : i32
    %c0_i32_0 = arith.constant 0 : i32
    %c0_i32_1 = arith.constant 0 : i32
    return %c0_i32, %c0_i32_0 : i32, i32
  }
  func.func @transform_1(%arg0: i32) -> (i32, i32) {
    %c0_i32 = arith.constant 0 : i32
    %c0_i32_0 = arith.constant 0 : i32
    %c0_i32_1 = arith.constant 0 : i32
    return %c0_i32, %c0_i32_0 : i32, i32
  }
  func.func @transform_2(%arg0: i32) -> (i32, i32) {
    %c0_i32 = arith.constant 0 : i32
    %c0_i32_0 = arith.constant 0 : i32
    %c0_i32_1 = arith.constant 0 : i32
    return %c0_i32, %c0_i32_0 : i32, i32
  }
  func.func @transform_3(%arg0: i32) -> (i32, i32) {
    %c0_i32 = arith.constant 0 : i32
    %c0_i32_0 = arith.constant 0 : i32
    %c0_i32_1 = arith.constant 0 : i32
    return %c0_i32, %c0_i32_0 : i32, i32
  }
  func.func @transform_4(%arg0: i32) -> (i32, i32) {
    %c0_i32 = arith.constant 0 : i32
    %c0_i32_0 = arith.constant 0 : i32
    %c0_i32_1 = arith.constant 0 : i32
    return %c0_i32, %c0_i32_0 : i32, i32
  }
  func.func @transform_5(%arg0: i32) -> (i32, i32) {
    %c0_i32 = arith.constant 0 : i32
    %c0_i32_0 = arith.constant 0 : i32
    %c0_i32_1 = arith.constant 0 : i32
    return %c0_i32, %c0_i32_0 : i32, i32
  }
  func.func @transform_6(%arg0: i32) -> (i32, i32) {
    %c0_i32 = arith.constant 0 : i32
    %c0_i32_0 = arith.constant 0 : i32
    %c0_i32_1 = arith.constant 0 : i32
    return %c0_i32, %c0_i32_0 : i32, i32
  }
}

</mosaic_0001>

<bundles_post_ra>
// kernel: gradient_penalty.1
= control target key start
LH: loop header
LB: loop body
LE: loop exit
PB: predicated region body
PF: predicated region fallthrough
CT: control target
= control target key end

     0   :  { %v943_v3 = vmov 0   ;;  %s1184_s0 = inlined_call_operand.vmem [shape: f32[2,1024], index: 0, kind: input, shape index: {}]   ;;  %s1185_s1 = inlined_call_operand.vmem [shape: f32[2,1024], index: 1, kind: input, shape index: {}]   ;;  %s1186_s2 = inlined_call_operand.vmem [shape: f32[32,1024], index: 2, kind: input, shape index: {}]   ;;  %s1187_s3 = inlined_call_operand.vmem [shape: f32[2,1], index: 3, kind: input, shape index: {}]   ;;  %s1188_s4 = inlined_call_operand.vmem [shape: f32[1,32], index: 4, kind: input, shape index: {}]   ;;  %s1189_s5 = inlined_call_operand.vmem [shape: f32[1,32], index: 5, kind: input, shape index: {}]   ;;  %s1190_s6 = inlined_call_operand.hbm [shape: f32[1,1], index: 6, kind: output, shape index: {}]  }
   0x1   :  { %v24_v0 = vld [vmem:[%s1187_s3] sm:$0x3]  ;;  %v155_v1 = vld [vmem:[%s1186_s2 + $0x18] sm:$0xff]  ;;  %910 = vset.pattern.permute.xlu0 %v943_v3  ;;  %v153_v5 = vld [vmem:[%s1186_s2 + $0x8] sm:$0xff] }
   0x2   :  { %v163_v2 = vld [vmem:[%s1186_s2 + $0x58] sm:$0xff]  ;;  %v161_v6 = vld [vmem:[%s1186_s2 + $0x48] sm:$0xff]  ;;  %v154_v7 = vld [vmem:[%s1186_s2 + $0x10] sm:$0xff]  ;;  %29 = vperm.xlu0 %910, %v24_v0   ;;  %v84_v8 = vsub.f32 1.0, %v24_v0 }
   0x3   :  { %v991_v4 = vpack.c.bf16 %v163_v2, %v155_v1  ;;  %v836_v9 = vpack.c.bf16 %v161_v6, %v153_v5  ;;  %v162_v10 = vld [vmem:[%s1186_s2 + $0x50] sm:$0xff]  ;;  %v152_v11 = vld [vmem:[%s1186_s2] sm:$0xff]  ;;  %v171_v15 = vld [vmem:[%s1186_s2 + $0x98] sm:$0xff] }
   0x4   :  { %v160_v12 = vld [vmem:[%s1186_s2 + $0x40] sm:$0xff]  ;;  %v1012_v13 = vpack.c.bf16 %v162_v10, %v154_v7  ;;  %v179_v16 = vld [vmem:[%s1186_s2 + $0xd8] sm:$0xff]  ;;  %v169_v17 = vld [vmem:[%s1186_s2 + $0x88] sm:$0xff] }
   0x5   :  { %845 = vmatprep.subr.bf16.mxu0 %v991_v4  ;;  %v1014_v14 = vpack.c.bf16 %v160_v12, %v152_v11  ;;  %837 = vmatprep.subr.bf16.mxu1 %v836_v9  ;;  %v1025_v18 = vpack.c.bf16 %v179_v16, %v171_v15  ;;  %v177_v19 = vld [vmem:[%s1186_s2 + $0xc8] sm:$0xff]  ;;  %v170_v21 = vld [vmem:[%s1186_s2 + $0x90] sm:$0xff]  ;;  %v168_v23 = vld [vmem:[%s1186_s2 + $0x80] sm:$0xff] }
   0x6   :  { %847 = vmatpush1.bf16.xpose.msra.mxu0 %v1012_v13  ;;  %v1032_v20 = vpack.c.bf16 %v177_v19, %v169_v17  ;;  %89 = vperm.xlu0 %910, %v84_v8   ;;  %v178_v22 = vld [vmem:[%s1186_s2 + $0xd0] sm:$0xff]  ;;  %v176_v24 = vld [vmem:[%s1186_s2 + $0xc0] sm:$0xff]  ;;  %v157_v25 = vld [vmem:[%s1186_s2 + $0x28] sm:$0xff] }
   0x7   :  { %839 = vmatpush1.bf16.xpose.msra.mxu1 %v1014_v14  ;;  %849 = vmatprep.subr.bf16.mxu0 %v1025_v18  ;;  %v165_v26 = vld [vmem:[%s1186_s2 + $0x68] sm:$0xff] }
   0x8   :  { %841 = vmatprep.subr.bf16.mxu1 %v1032_v20 }
   0x9   :  { %11 = vsyncpa [#allocation3], 0  ;;  %v1054_v27 = vpack.c.bf16 %v178_v22, %v170_v21  ;;  %v1056_v28 = vpack.c.bf16 %v176_v24, %v168_v23  ;;  %v1058_v29 = vpack.c.bf16 %v165_v26, %v157_v25  ;;  %v944_v30 = vmov 1983009808   ;;  %v25_v35 = vld [vmem:[%s1184_s0] sm:$0xff]  ;;  %v26_v44 = vld [vmem:[%s1184_s0 + $0x8] sm:$0xff] }
   0xa   :  { %v36_v31 = vunpack.c.l.s4 %v944_v30  ;;  %v38_v32 = vlaneseq  ;;  %v85_v36 = vld [vmem:[%s1185_s1] sm:$0xff]  ;;  %v34_v38 = vcombine.high %v25_v35, %v25_v35  ;;  %v86_v45 = vld [vmem:[%s1185_s1 + $0x8] sm:$0xff]  ;;  %v51_v17 = vcombine.high %v26_v44, %v26_v44  ;;  %v159_v22 = vld [vmem:[%s1186_s2 + $0x38] sm:$0xff] }
   0xb   :  { %v94_v39 = vcombine.high %v85_v36, %v85_v36  ;;  %v156_v55 = vld [vmem:[%s1186_s2 + $0x20] sm:$0xff]  ;;  %v173_v2 = vld [vmem:[%s1186_s2 + $0xa8] sm:$0xff]  ;;  %v111_v16 = vcombine.high %v86_v45, %v86_v45  ;;  %v167_v23 = vld [vmem:[%s1186_s2 + $0x78] sm:$0xff]  ;;  %vm482_vm0 = vcmask 261120   ;;  %vm778_vm1 = vcmask 1041408  }
   0xc   :  { %v37_v33 = vunpack.c.0.s8 %v36_v31  ;;  %v39_v34 = vshrl.u32 %v38_v32, 7  ;;  %v164_v56 = vld [vmem:[%s1186_s2 + $0x60] sm:$0xff]  ;;  %v181_v3 = vld [vmem:[%s1186_s2 + $0xe8] sm:$0xff]  ;;  %v860_v30 = vpack.c.bf16 %v167_v23, %v159_v22  ;;  %vm813_vm4 = vcmask 0  }
   0xd   :  { %v1099_v5 = vpack.c.bf16 %v164_v56, %v156_v55  ;;  %v1103_v12 = vpack.c.bf16 %v181_v3, %v173_v2  ;;  %v172_v19 = vld [vmem:[%s1186_s2 + $0xa0] sm:$0xff] }
   0xe   :  { %851 = vmatpush1.bf16.xpose.msra.mxu0 %v1054_v27  ;;  %v40_v37 = vsub.s32 %v37_v33, %v39_v34  ;;  %v180_v21 = vld [vmem:[%s1186_s2 + $0xe0] sm:$0xff]  ;;  %v158_v33 = vld [vmem:[%s1186_s2 + $0x30] sm:$0xff] }
   0xf   :  { %843 = vmatpush1.bf16.xpose.msra.mxu1 %v1056_v28  ;;  %853 = vmatprep.subr.bf16.mxu0 %v1058_v29  ;;  %v858_v25 = vpack.c.bf16 %v180_v21, %v172_v19 }
  0x10   :  { %869 = vmatprep.subr.bf16.mxu1 %v836_v9  ;;  %v41_v40 = vrot.slane %v25_v35, %v40_v37  ;;  %v48_v41 = vrot.slane %v34_v38, %v40_v37  ;;  %v101_v42 = vrot.slane %v85_v36, %v40_v37  ;;  %v108_v43 = vrot.slane %v94_v39, %v40_v37 }
  0x11   :  { %v58_v46 = vrot.slane %v26_v44, %v40_v37  ;;  %v118_v47 = vrot.slane %v86_v45, %v40_v37  ;;  %v125_v24 = vrot.slane %v111_v16, %v40_v37  ;;  %v65_v26 = vrot.slane %v51_v17, %v40_v37 }
  0x12   :  { %v49_v49 = vcombine.high %v41_v40, %v41_v40  ;;  %v50_v50 = vcombine.high %v48_v41, %v48_v41  ;;  %v109_v51 = vcombine.high %v101_v42, %v101_v42  ;;  %v110_v52 = vcombine.high %v108_v43, %v108_v43 }
  0x13   :  { %v66_v53 = vcombine.high %v58_v46, %v58_v46  ;;  %v126_v54 = vcombine.high %v118_v47, %v118_v47  ;;  %v127_v31 = vcombine.high %v125_v24, %v125_v24 }
  0x81   :  { %v1075_v48 = vpop.permute.xlu0 %29 }
  0x82   :  { %v77_v58 = vmul.f32 %v49_v49, %v1075_v48  ;;  %v79_v59 = vmul.f32 %v50_v50, %v1075_v48  ;;  %v76_v60 = vmul.f32 %v41_v40, %v1075_v48  ;;  %v78_v61 = vmul.f32 %v48_v41, %v1075_v48  ;;  %v174_v41 = vld [vmem:[%s1186_s2 + $0xb0] sm:$0xff] }
  0x83   :  { %v81_v6 = vmul.f32 %v66_v53, %v1075_v48  ;;  %v80_v35 = vmul.f32 %v58_v46, %v1075_v48  ;;  %v82_v45 = vmul.f32 %v65_v26, %v1075_v48 }
  0x85   :  { %v1083_v57 = vpop.permute.xlu0 %89 }
  0x86   :  { %v137_v62 = vmul.f32 %v109_v51, %v1083_v57  ;;  %v139_v63 = vmul.f32 %v110_v52, %v1083_v57  ;;  %v136_v0 = vmul.f32 %v101_v42, %v1083_v57  ;;  %v138_v1 = vmul.f32 %v108_v43, %v1083_v57  ;;  %v182_v42 = vld [vmem:[%s1186_s2 + $0xf0] sm:$0xff]  ;;  %v829_v51 = vld [vmem:[%s1188_s4] ss:$0 sm:$0xff]  ;;  %s946_s4 = smov [#allocation2]  }
  0x87   :  { %v141_v7 = vmul.f32 %v126_v54, %v1083_v57  ;;  %v140_v32 = vmul.f32 %v118_v47, %v1083_v57  ;;  %v143_v34 = vmul.f32 %v127_v31, %v1083_v57  ;;  %v866_v43 = vpack.c.bf16 %v182_v42, %v174_v41 }
  0x88   :  { %v145_v8 = vadd.f32 %v137_v62, %v77_v58  ;;  %v147_v9 = vadd.f32 %v139_v63, %v79_v59  ;;  %v144_v10 = vadd.f32 %v136_v0, %v76_v60  ;;  %v146_v11 = vadd.f32 %v138_v1, %v78_v61 }
  0x89   :  { %v149_v15 = vadd.f32 %v141_v7, %v81_v6  ;;  %v148_v38 = vadd.f32 %v140_v32, %v80_v35  ;;  %v142_v44 = vmul.f32 %v125_v24, %v1083_v57  ;;  %v945_v47 = vmov 0.0  }
  0x8a   :  { %255 = vmatprep.mubr.f32.mxu1 %v145_v8  ;;  %325 = vmatprep.mubr.f32.mxu0 %v147_v9 }
  0x8b   :  { %256 = vmatmul.mubr.f32.vlgmr.msra.gmra.mrb[0].mxu1 %v144_v10  ;;  %326 = vmatmul.mubr.f32.vlgmr.msra.gmra.mrb[0].mxu0 %v146_v11  ;;  %v150_v46 = vadd.f32 %v142_v44, %v82_v45 }
  0x8c   :  { %855 = vmatpush1.bf16.xpose.msra.mxu0 %v1099_v5  ;;  %395 = vmatprep.mubr.f32.mxu0 %v149_v15 }
  0x8d   :  { %857 = vmatprep.subr.bf16.mxu0 %v1103_v12  ;;  %871 = vmatpush1.bf16.msra.mxu1 %v1014_v14  ;;  %v67_v14 = vcombine.high %v65_v26, %v65_v26 }
  0x8e   :  { %873 = vmatprep.subr.bf16.mxu1 %v1032_v20  ;;  %v166_v20 = vld [vmem:[%s1186_s2 + $0x70] sm:$0xff]  ;;  %550 = vmatprep.mubr.f32.mxu1 %v945_v47 }
  0x8f   :  { %v862_v36 = vpack.c.bf16 %v166_v20, %v158_v33  ;;  %v83_v37 = vmul.f32 %v67_v14, %v1075_v48  ;;  %v830_v48 = vld [vmem:[%s1189_s5] ss:$0 sm:$0xff]  ;;  %s821_s5 = sshll.u32 %s946_s4, 4  ;;  %s822_s5 = int_to_ptr.vmem [resolvable:$true] %s821_s5 }
  0x90   :  { %s919_s1 = scalar_lea.vmem %s822_s5, 16  ;;  %s923_s20 = scalar_lea.vmem %s822_s5, 32 }
  0x91   :  { %875 = vmatpush1.bf16.msra.mxu1 %v1056_v28  ;;  %v175_v28 = vld [vmem:[%s1186_s2 + $0xb8] sm:$0xff]  ;;  %v151_v40 = vadd.f32 %v143_v34, %v83_v37  ;;  %p920_p0 = scmp.ne.s32.totalorder %s822_s5, %s919_s1  ;;  %p924_p1 = scmp.lt.s32.totalorder %s822_s5, %s822_s5 }
  0x92   :  { %877 = vmatprep.subr.bf16.mxu1 %v991_v4  ;;  %v183_v4 = vld [vmem:[%s1186_s2 + $0xf8] sm:$0xff]  ;;  %p925_p2 = scmp.lt.s32.totalorder %s923_s20, %s919_s1 }
  0x93   :  { %v864_v39 = vpack.c.bf16 %v183_v4, %v175_v28 }
  0x94   :  { %859 = vmatpush1.bf16.xpose.msra.mxu0 %v858_v25  ;;  %p926_p3 = por %p925_p2, %p924_p1 }
  0x95   :  { %861 = vmatprep.subr.bf16.mxu0 %v860_v30 }
  0x96   :  { %p927_p4 = pnand %p926_p3, %p920_p0 }
  0x9b   :  { %396 = vmatmul.mubr.f32.vlgmr.msra.gmra.mrb[0].mxu0 %v148_v38 }
  0x9c   :  { %863 = vmatpush1.bf16.xpose.msra.mxu0 %v862_v36  ;;  %465 = vmatprep.mubr.f32.mxu0 %v151_v40 }
  0x9d   :  { %865 = vmatprep.subr.bf16.mxu0 %v864_v39 }
  0xa4   :  { %867 = vmatpush1.bf16.xpose.msra.mxu0 %v866_v43 }
  0xab   :  { %466 = vmatmul.mubr.f32.vlgmr.msra.gmra.mrb[0].mxu0 %v150_v46 }
 0x15e   :  { %v257_v49 = vpop.f32.mrb[0].mxu1 }
 0x15f   :  { %v259_v50 = vpop.f32.mrb[1].mxu1  ;;  %v258_v52 = vadd.f32 %v829_v51, %v257_v49 }
 0x17e   :  { %v467_v53 = vpop.f32.mrb[0].mxu0 }
 0x17f   :  { %v901_v54 = vadd.f32 %v467_v53, %v258_v52  ;;  %v469_v55 = vpop.f32.mrb[1].mxu0 }
 0x181   :  { %915 = vtanh.f32 %v901_v54 }
 0x18b   :  { %v916_v56 = vpop.eup %915 }
 0x18c   :  { %v472_v58 = vmul.f32 %v916_v56, %v916_v56 }
 0x18e   :  { %v473_v57 = vsub.f32 1.0, %v472_v58 }
 0x190   :  { %v481_v59 = vmul.f32 %v830_v48, %v473_v57 }
 0x192   :  { %831 = vmatmul.mubr.msk.f32.vlgmr.msra.gmra.mrb[2].mxu1 %vm482_vm0, %v481_v59 }
 0x193   :  { %879 = vmatpush1.bf16.msra.mxu1 %v1012_v13  ;;  %621 = vmatprep.mubr.f32.mxu1 %v945_v47 }
 0x194   :  { %881 = vmatprep.subr.bf16.mxu1 %v1025_v18 }
 0x197   :  { %883 = vmatpush1.bf16.msra.mxu1 %v1054_v27 }
 0x198   :  { %885 = vmatprep.subr.bf16.mxu1 %v1058_v29 }
 0x19a   :  { %832 = vmatmul.mubr.msk.f32.vlgmr.msra.gmra.mrb[4].mxu1 %vm482_vm0, %v481_v59 }
 0x19b   :  { %887 = vmatpush1.bf16.msra.mxu1 %v1099_v5  ;;  %692 = vmatprep.mubr.f32.mxu1 %v945_v47 }
 0x19c   :  { %889 = vmatprep.subr.bf16.mxu1 %v1103_v12 }
 0x19f   :  { %891 = vmatpush1.bf16.msra.mxu1 %v858_v25 }
 0x1a0   :  { %893 = vmatprep.subr.bf16.mxu1 %v860_v30 }
 0x1a2   :  { %833 = vmatmul.mubr.msk.f32.vlgmr.msra.gmra.mrb[6].mxu1 %vm482_vm0, %v481_v59 }
 0x1a3   :  { %895 = vmatpush1.bf16.msra.mxu1 %v862_v36  ;;  %763 = vmatprep.mubr.f32.mxu1 %v945_v47 }
 0x1a4   :  { %897 = vmatprep.subr.bf16.mxu1 %v864_v39 }
 0x1a7   :  { %899 = vmatpush1.bf16.msra.mxu1 %v866_v43 }
 0x1aa   :  { %834 = vmatmul.mubr.msk.f32.vlgmr.msra.gmra.mrb[8].mxu1 %vm482_vm0, %v481_v59 }
 0x265   :  { %v552_v13 = vpop.f32.mrb[2].mxu1 }
 0x266   :  { %v770_v18 = vmul.f32 %v552_v13, %v552_v13  ;;  %v554_v27 = vpop.f32.mrb[3].mxu1 }
 0x267   :  { %v771_v29 = vmul.f32 %v554_v27, %v554_v27 }
 0x268   :  { %v779_v60 = vsel %vm778_vm1, %v770_v18, 0.0 }
 0x269   :  { %v780_v61 = vsel %vm778_vm1, %v771_v29, 0.0 }
 0x26a   :  { %v781_v62 = vadd.f32 %v780_v61, %v779_v60 }
 0x26d   :  { %v623_v63 = vpop.f32.mrb[4].mxu1 }
 0x26e   :  { %v772_v0 = vmul.f32 %v623_v63, %v623_v63  ;;  %v625_v1 = vpop.f32.mrb[5].mxu1 }
 0x26f   :  { %v773_v2 = vmul.f32 %v625_v1, %v625_v1 }
 0x270   :  { %v782_v3 = vsel %vm778_vm1, %v772_v0, 0.0 }
 0x271   :  { %v783_v5 = vadd.f32 %v782_v3, %v781_v62  ;;  %v784_v6 = vsel %vm778_vm1, %v773_v2, 0.0 }
 0x273   :  { %v785_v7 = vadd.f32 %v784_v6, %v783_v5 }
 0x275   :  { %v694_v8 = vpop.f32.mrb[6].mxu1 }
 0x276   :  { %v774_v9 = vmul.f32 %v694_v8, %v694_v8  ;;  %v696_v10 = vpop.f32.mrb[7].mxu1 }
 0x277   :  { %v775_v11 = vmul.f32 %v696_v10, %v696_v10 }
 0x278   :  { %v786_v12 = vsel %vm778_vm1, %v774_v9, 0.0 }
 0x279   :  { %v787_v15 = vadd.f32 %v786_v12, %v785_v7  ;;  %v788_v16 = vsel %vm778_vm1, %v775_v11, 0.0 }
 0x27b   :  { %v789_v17 = vadd.f32 %v788_v16, %v787_v15 }
 0x27d   :  { %v765_v19 = vpop.f32.mrb[8].mxu1 }
 0x27e   :  { %v776_v21 = vmul.f32 %v765_v19, %v765_v19  ;;  %v767_v22 = vpop.f32.mrb[9].mxu1 }
 0x27f   :  { %v777_v23 = vmul.f32 %v767_v22, %v767_v22 }
 0x280   :  { %v790_v24 = vsel %vm778_vm1, %v776_v21, 0.0 }
 0x281   :  { %v791_v25 = vadd.f32 %v790_v24, %v789_v17  ;;  %v792_v26 = vsel %vm778_vm1, %v777_v23, 0.0 }
 0x283   :  { %v793_v30 = vadd.f32 %v792_v26, %v791_v25 }
 0x285   :  { %794 = vadd.xlane.f32.xlu1 %v793_v30 }
 0x312   :  { %v795_v31 = vpop.xlane.xlu1 %794 }
 0x313   :  { %917 = vrsqrt.f32 %v795_v31  ;;  %vm798_vm2 = vcmp.eq.f32.partialorder %v795_v31, inf  ;;  %v801_v33 = vand.u32 2147483648, %v795_v31  ;;  %vm800_vm3 = vcmp.eq.f32.partialorder %v795_v31, 0.0 }
 0x31d   :  { %v918_v14 = vpop.eup %917 }
 0x31e   :  { %v797_v32 = vmul.f32 %v918_v14, %v795_v31 }
 0x320   :  { %v799_v20 = vsel %vm798_vm2, %v795_v31, %v797_v32 }
 0x321   :  { %v802_v34 = vsel %vm800_vm3, %v801_v33, %v799_v20 }
 0x322   :  { %v835_v28 = vadd.f32 -1.0, %v802_v34 }
 0x324   :  { %v804_v4 = vmul.f32 %v835_v28, %v835_v28 }
 0x326   :  { %v805_v35 = vsel %vm778_vm1, %v804_v4, 0.0 }
 0x327   :  { %v806_v36 = vrot.slane %v805_v35, 4 }
 0x329   :  { %v807_v37 = vadd.f32 %v806_v36, %v805_v35 }
 0x32b   :  { %v808_v38 = vrot.slane %v807_v37, 2 }
 0x32d   :  { %v809_v39 = vadd.f32 %v808_v38, %v807_v37 }
 0x32f   :  { %v810_v40 = vrot.slane %v809_v39, 1 }
 0x331   :  { %v811_v41 = vadd.f32 %v810_v40, %v809_v39 }
 0x333   :  { %v812_v42 = vmul.f32 0.5, %v811_v41 }
 0x335   :  { %814 = vst.msk [vmem:[#allocation2] sm:$0x1] %vm813_vm4, %v812_v42 }
 0x336   :  { %930 = shalt.err (!%p927_p4)
}
 0x337   :  { %s931_s23 = scalar_lea.hbm %s1190_s6, 16 }
 0x338   :  { %p932_p5 = scmp.ne.s32.totalorder %s1190_s6, %s931_s23  ;;  %p935_p6 = scmp.lt.u32.totalorder %s931_s23, %s1190_s6 }
 0x33a   :  { %p937_p7 = pnand %p935_p6, %p932_p5 }
 0x33c   :  { %940 = shalt.err (!%p937_p7)
}
 0x33d   :  { %824 = dma.vmem_to_hbm [thread:$0]  %s822_s5, 16, %s1190_s6, [#allocation3]  }
 0x33e   :  { %941 = dma.done.wait [#allocation3], 16  }
 0x33f   :  { %942 = vsyncadd [#allocation3], 4294967280 }
 0x340   :  { %828 = vsyncpa [#allocation3], 1 }

</bundles_post_ra>
